<compile_context>
chip_gen: v7x
topology: tpu7x:2x2x1
jax: 0.10.0
libtpu: 0.0.40
codegen_flags: <defaults>
</compile_context>

<pallas_src>
import functools

import jax
import jax.numpy as jnp
from jax.experimental import pallas as pl
from jax.experimental.pallas import tpu as pltpu


def _round_up(x, m):
    return (x + m - 1) // m * m


# ---------------------------------------------------------------------------
# Stage 1:  Ys = d^{-1/2} * (X @ W^T)      (row-tiled, lane-dense out_p)
# ---------------------------------------------------------------------------
def _xw_scale_kernel(x_ref, wt_ref, dis_ref, ys_ref):
    xw = jnp.dot(x_ref[...], wt_ref[...], preferred_element_type=jnp.float32)
    ys_ref[...] = (dis_ref[...] * xw).astype(ys_ref.dtype)


# ---------------------------------------------------------------------------
# Stage 2:  out = ReLU( d^{-1/2} * (A_t @ Ys) + b ),  A_t = A + 2I (pre-folded)
#   grid = (row tiles i, K tiles k); accumulate directly into the f32 output
#   block (its index is constant across k); bias/scale/ReLU in the last-K
#   finalize branch only.
# ---------------------------------------------------------------------------
def _gcn_agg_kernel(a_ref, ys_ref, dis_ref, b_ref, o_ref, *, ys_resident, tile):
    k = pl.program_id(1)

    @pl.when(k == 0)
    def _():
        o_ref[...] = jnp.zeros_like(o_ref)

    a = a_ref[...].astype(ys_ref.dtype)          # int8 -> f32/bf16 upcast (VPU, free filler)
    if ys_resident:
        start = pl.multiple_of(k * tile, 256)
        ys_k = ys_ref[pl.ds(start, tile), :]     # slice the VMEM-resident Ys
    else:
        ys_k = ys_ref[...]                       # streamed K-block fallback
    o_ref[...] += jnp.dot(a, ys_k, preferred_element_type=jnp.float32)

    @pl.when(k == pl.num_programs(1) - 1)
    def _():
        out = dis_ref[...] * o_ref[...] + b_ref[...]
        o_ref[...] = jnp.maximum(out, 0.0)


def gcn_forward(X, A, W, b, *, tile=1024, a_dtype=jnp.int8,
                compute_dtype=jnp.float32,
                vmem_limit_bytes=48 * 1024 * 1024):
    """X: (N, in_dim), A: (N, N) 0/1 adjacency, W: (out_dim, in_dim), b: (out_dim,)."""
    N, in_dim = X.shape
    out_dim = W.shape[0]
    f32 = jnp.float32

    # Lane-dense padded output width (multiple of 128 -> unmasked stores).
    out_p = _round_up(out_dim, 128)

    # Row/K tiling: pad N to a multiple of 256 only; pick the largest tile
    # (multiple of 256, <= `tile`) that divides Np, and keep >= 2 row tiles
    # when possible so the "parallel" axis splits across v7x's 2 TensorCores.
    Np = _round_up(N, 256)
    tile = max(256, _round_up(tile, 256))
    t = min(tile, Np)
    while Np % t != 0:
        t -= 256
    if Np // t < 2 and Np >= 512:
        cand = max(256, (t // 2 // 256) * 256)
        while Np % cand != 0:
            cand -= 256
        t = cand
    num_tiles = Np // t
    pad = Np - N

    # --- wrapper plumbing (single narrow pass over A) ------------------------
    # Cast to int8 (0/1 exact), pad, and fold 2*I in via a fused elementwise
    # add (entries become {0,1,2,3}, still exact in int8/bf16). Padded rows
    # get a diagonal 2 so their degree is 2 (no rsqrt(0)); they are sliced off.
    A_p = jnp.pad(A.astype(a_dtype), ((0, pad), (0, pad)))
    A_p = A_p + jnp.eye(Np, dtype=a_dtype) * 2
    deg = jnp.sum(A_p, axis=1, dtype=f32)          # f32 accumulation of the rowsum
    dis = jax.lax.rsqrt(deg).reshape(Np, 1)        # (Np, 1) f32

    X_p = jnp.pad(X, ((0, pad), (0, 0))).astype(compute_dtype)
    Wt_p = jnp.pad(W.T, ((0, 0), (0, out_p - out_dim))).astype(compute_dtype)
    b_p = jnp.pad(b, (0, out_p - out_dim)).reshape(1, out_p).astype(f32)

    comp_bytes = jnp.dtype(compute_dtype).itemsize
    a_bytes = jnp.dtype(a_dtype).itemsize

    # --- stage 1: Ys = d^{-1/2} * (X @ W^T) ----------------------------------
    # Guard against very large in_dim blowing the VMEM budget (double-buffered
    # X blocks + the full W^T block): shrink the stage-1 row tile if needed.
    def _s1_bytes(tt):
        return (2 * tt * in_dim + 2 * in_dim * out_p + 2 * tt * out_p) * comp_bytes + 2 * tt * 4
    t1 = t
    if _s1_bytes(t1) > (vmem_limit_bytes * 3) // 4:
        t1 = 256
    # TODO(synk): add a K axis over in_dim if the (in_dim, out_p) W^T block alone
    # ever outgrows VMEM; unnecessary for typical GCN feature widths.

    ys = pl.pallas_call(
        _xw_scale_kernel,
        out_shape=jax.ShapeDtypeStruct((Np, out_p), compute_dtype),
        grid=(Np // t1,),
        in_specs=[
            pl.BlockSpec((t1, in_dim), lambda i: (i, 0)),
            pl.BlockSpec((in_dim, out_p), lambda i: (0, 0)),
            pl.BlockSpec((t1, 1), lambda i: (i, 0)),
        ],
        out_specs=pl.BlockSpec((t1, out_p), lambda i: (i, 0)),
        compiler_params=pltpu.CompilerParams(
            dimension_semantics=("parallel",),
            vmem_limit_bytes=vmem_limit_bytes,
        ),
    )(X_p, Wt_p, dis)

    # --- stage 2: out = ReLU( d^{-1/2} * (A_t @ Ys) + b ) --------------------
    # Keep Ys fully VMEM-resident when it fits (accounting for double
    # buffering); otherwise stream a (t, out_p) K-block per grid step.
    ys_full_bytes = 2 * Np * out_p * comp_bytes
    fixed_bytes = 2 * t * t * a_bytes + 2 * t * out_p * 4 + 2 * t * 4 + 4 * out_p
    ys_resident = (ys_full_bytes + fixed_bytes) <= (vmem_limit_bytes * 3) // 4

    if ys_resident:
        ys_spec = pl.BlockSpec((Np, out_p), lambda i, k: (0, 0))
    else:
        ys_spec = pl.BlockSpec((t, out_p), lambda i, k: (k, 0))

    kernel = functools.partial(_gcn_agg_kernel, ys_resident=ys_resident, tile=t)

    out = pl.pallas_call(
        kernel,
        out_shape=jax.ShapeDtypeStruct((Np, out_p), f32),
        grid=(num_tiles, num_tiles),
        in_specs=[
            pl.BlockSpec((t, t), lambda i, k: (i, k)),     # A_t tile (int8 in HBM)
            ys_spec,                                       # Ys (resident or streamed)
            pl.BlockSpec((t, 1), lambda i, k: (i, 0)),     # d^{-1/2} rows
            pl.BlockSpec((1, out_p), lambda i, k: (0, 0)),  # bias
        ],
        out_specs=pl.BlockSpec((t, out_p), lambda i, k: (i, 0)),
        compiler_params=pltpu.CompilerParams(
            dimension_semantics=("parallel", "arbitrary"),
            vmem_limit_bytes=vmem_limit_bytes,
        ),
    )(A_p, ys, dis, b_p)

    return out[:N, :out_dim]


def reference_forward(X, A, W, b):
    """Plain-JAX reference mirroring the PyTorch module."""
    N = A.shape[0]
    A_t = A + 2.0 * jnp.eye(N, dtype=A.dtype)
    d = jnp.sum(A_t, axis=1)
    D_inv_sqrt = jnp.diag(1.0 / jnp.sqrt(d))
    A_norm = D_inv_sqrt @ A_t @ D_inv_sqrt
    AX = A_norm @ X
    out = AX @ W.T + b
    return jnp.maximum(out, 0.0)


if __name__ == "__main__":
    key = jax.random.PRNGKey(0)
    k_x, k_a, k_w, k_b = jax.random.split(key, 4)

    N, input_dim, output_dim = 8, 32, 16

    # Node features and a symmetric 0/1 adjacency matrix.
    X = jax.random.normal(k_x, (N, input_dim), dtype=jnp.float32)
    A_raw = (jax.random.uniform(k_a, (N, N)) > 0.5).astype(jnp.float32)
    A = jnp.maximum(A_raw, A_raw.T)

    # Deterministic parameter init mirroring nn.Linear + xavier_uniform_ on weight.
    limit_w = (6.0 / (input_dim + output_dim)) ** 0.5
    W = jax.random.uniform(k_w, (output_dim, input_dim),
                           minval=-limit_w, maxval=limit_w, dtype=jnp.float32)
    limit_b = 1.0 / (input_dim ** 0.5)
    b = jax.random.uniform(k_b, (output_dim,),
                           minval=-limit_b, maxval=limit_b, dtype=jnp.float32)

    ref = reference_forward(X, A, W, b)

    # Default path: A int8 in HBM (exact), X/W/Ys f32 -> tight check.
    out = jax.block_until_ready(gcn_forward(X, A, W, b))
    assert out.shape == (N, output_dim)
    assert jnp.allclose(out, ref, atol=1e-4, rtol=1e-4), "f32 mismatch vs reference"

    # bf16 compute path (halves Ys/X/W bytes, full-rate MXU on v5e/v6e);
    # A stays exact int8; looser tolerance for bf16 rounding of X/W/Ys.
    out_bf16 = jax.block_until_ready(
        gcn_forward(X, A, W, b, compute_dtype=jnp.bfloat16))
    assert out_bf16.shape == (N, output_dim)
    assert jnp.allclose(out_bf16, ref, atol=5e-2, rtol=5e-2), "bf16 mismatch vs reference"

    print("KERNEL_OK")
</pallas_src>

<mosaic_0001>
module attributes {stable_mosaic.version = 11 : i64} {
  func.func @_xw_scale_kernel(%arg0: i32, %arg1: memref<256x32xf32, #tpu.memory_space<vmem>>, %arg2: memref<32x128xf32, #tpu.memory_space<vmem>>, %arg3: memref<256x1xf32, #tpu.memory_space<vmem>>, %arg4: memref<256x128xf32, #tpu.memory_space<vmem>>) attributes {dimension_semantics = [#tpu.dimension_semantics<parallel>], iteration_bounds = array<i64: 1>, scalar_prefetch = 0 : i64, scratch_operands = 0 : i64, tpu.core_type = #tpu.core_type<tc>, window_params = [{transform_indices = @transform_0, window_bounds = array<i64: 256, 32>}, {pipeline_mode = #tpu.pipeline_mode<synchronous>, transform_indices = @transform_1, window_bounds = array<i64: 32, 128>}, {transform_indices = @transform_2, window_bounds = array<i64: 256, 1>}, {transform_indices = @transform_3, window_bounds = array<i64: 256, 128>}]} {
    %c0 = arith.constant 0 : index
    %c0_0 = arith.constant 0 : index
    %0 = vector.load %arg1[%c0, %c0_0] : memref<256x32xf32, #tpu.memory_space<vmem>>, vector<256x32xf32>
    %c0_1 = arith.constant 0 : index
    %c0_2 = arith.constant 0 : index
    %1 = vector.load %arg2[%c0_1, %c0_2] : memref<32x128xf32, #tpu.memory_space<vmem>>, vector<32x128xf32>
    %cst = arith.constant dense<0.000000e+00> : vector<256x128xf32>
    %2 = tpu.matmul %0, %1, %cst {dimension_numbers = #tpu.dot_dimension_numbers<[1], [0], [0], [1], [0, 0, 1, 1], [], []>} : vector<256x32xf32>, vector<32x128xf32>, vector<256x128xf32> -> vector<256x128xf32>
    %c0_3 = arith.constant 0 : index
    %c0_4 = arith.constant 0 : index
    %3 = vector.load %arg3[%c0_3, %c0_4] : memref<256x1xf32, #tpu.memory_space<vmem>>, vector<256x1xf32>
    %4 = vector.broadcast %3 : vector<256x1xf32> to vector<256x128xf32>
    %5 = arith.mulf %4, %2 : vector<256x128xf32>
    %c0_5 = arith.constant 0 : index
    %c0_6 = arith.constant 0 : index
    %6 = vector.load %arg4[%c0_5, %c0_6] : memref<256x128xf32, #tpu.memory_space<vmem>>, vector<256x128xf32>
    tpu.vector_store %arg4[%c0_5, %c0_6], %5 {strides = array<i32>} : memref<256x128xf32, #tpu.memory_space<vmem>>, vector<256x128xf32>,
    return
  }
  func.func @transform_0(%arg0: i32) -> (i32, i32) {
    %c0_i32 = arith.constant 0 : i32
    %c0_i32_0 = arith.constant 0 : i32
    return %arg0, %c0_i32 : i32, i32
  }
  func.func @transform_1(%arg0: i32) -> (i32, i32) {
    %c0_i32 = arith.constant 0 : i32
    %c0_i32_0 = arith.constant 0 : i32
    %c0_i32_1 = arith.constant 0 : i32
    return %c0_i32, %c0_i32_0 : i32, i32
  }
  func.func @transform_2(%arg0: i32) -> (i32, i32) {
    %c0_i32 = arith.constant 0 : i32
    %c0_i32_0 = arith.constant 0 : i32
    return %arg0, %c0_i32 : i32, i32
  }
  func.func @transform_3(%arg0: i32) -> (i32, i32) {
    %c0_i32 = arith.constant 0 : i32
    %c0_i32_0 = arith.constant 0 : i32
    return %arg0, %c0_i32 : i32, i32
  }
}

</mosaic_0001>

<bundles_post_ra>
// kernel: tpu_custom_call.1
= control target key start
LH: loop header
LB: loop body
LE: loop exit
PB: predicated region body
PF: predicated region fallthrough
CT: control target
= control target key end

     0   :  { %v811_v3 = vmov 0   ;;  %vm51_vm0 = vcmask 261120   ;;  %s1110_s0 = inlined_call_operand.vmem [shape: f32[256,32], index: 0, kind: input, shape index: {}]   ;;  %s1111_s1 = inlined_call_operand.vmem [shape: f32[32,128], index: 1, kind: input, shape index: {}]   ;;  %s1112_s2 = inlined_call_operand.vmem [shape: f32[256,1], index: 2, kind: input, shape index: {}]   ;;  %s1113_s3 = inlined_call_operand.hbm [shape: f32[256,128], index: 3, kind: output, shape index: {}]  }
   0x1   :  { %v47_v0 = vld [vmem:[%s1111_s1] sm:$0xff]  ;;  %v48_v1 = vld [vmem:[%s1111_s1 + $0x8] sm:$0xff]  ;;  %v375_v2 = vld [vmem:[%s1112_s2 + $0x10] sm:$0xff]  ;;  %786 = vset.pattern.permute.xlu1 %v811_v3  ;;  %785 = vset.pattern.permute.xlu0 %v811_v3 }
   0x2   :  { %v769_v4 = vpack.c.bf16 %v48_v1, %v47_v0  ;;  %v373_v5 = vld [vmem:[%s1112_s2] sm:$0xff]  ;;  %v49_v6 = vld [vmem:[%s1111_s1 + $0x10] sm:$0xff]  ;;  %v50_v7 = vld [vmem:[%s1111_s1 + $0x18] sm:$0xff]  ;;  %417 = vperm.xlu1 %786, %v375_v2  }
   0x3   :  { %407 = vperm.xlu0 %785, %v373_v5   ;;  %v773_v8 = vpack.c.bf16 %v50_v7, %v49_v6  ;;  %v376_v9 = vld [vmem:[%s1112_s2 + $0x18] sm:$0xff]  ;;  %v374_v10 = vld [vmem:[%s1112_s2 + $0x8] sm:$0xff]  ;;  %v15_v11 = vld [vmem:[%s1110_s0] sm:$0xff] }
   0x4   :  { %770 = vmatprep.subr.bf16.mxu0 %v769_v4  ;;  %777 = vmatprep.subr.bf16.mxu1 %v769_v4  ;;  %v31_v12 = vld [vmem:[%s1110_s0 + $0x80] sm:$0xff]  ;;  %v378_v13 = vld [vmem:[%s1112_s2 + $0x28] sm:$0xff]  ;;  %v17_v17 = vld [vmem:[%s1110_s0 + $0x10] sm:$0xff] }
   0x5   :  { %772 = vmatpush3.bf16.msra.mxu0 %v769_v4  ;;  %779 = vmatpush3.bf16.msra.mxu1 %v769_v4  ;;  %v377_v14 = vld [vmem:[%s1112_s2 + $0x20] sm:$0xff]  ;;  %v16_v15 = vld [vmem:[%s1110_s0 + $0x8] sm:$0xff]  ;;  %v33_v18 = vld [vmem:[%s1110_s0 + $0x90] sm:$0xff] }
   0x6   :  { %774 = vmatprep.subr.bf16.mxu0 %v773_v8  ;;  %778 = vmatprep.subr.bf16.mxu1 %v773_v8  ;;  %v32_v16 = vld [vmem:[%s1110_s0 + $0x88] sm:$0xff]  ;;  %v380_v19 = vld [vmem:[%s1112_s2 + $0x38] sm:$0xff]  ;;  %v379_v20 = vld [vmem:[%s1112_s2 + $0x30] sm:$0xff] }
   0x7   :  { %422 = vperm.xlu1 %786, %v376_v9   ;;  %412 = vperm.xlu0 %785, %v374_v10   ;;  %v18_v21 = vld [vmem:[%s1110_s0 + $0x18] sm:$0xff]  ;;  %v19_v23 = vld [vmem:[%s1110_s0 + $0x20] sm:$0xff]  ;;  %v382_v25 = vld [vmem:[%s1112_s2 + $0x48] sm:$0xff] }
   0x8   :  { %721 = vmatprep.mubr.msk.f32.mxu0 %vm51_vm0, %v15_v11  ;;  %745 = vmatprep.mubr.msk.f32.mxu1 %vm51_vm0, %v31_v12  ;;  %v34_v22 = vld [vmem:[%s1110_s0 + $0x98] sm:$0xff]  ;;  %v35_v24 = vld [vmem:[%s1110_s0 + $0xa0] sm:$0xff]  ;;  %v20_v27 = vld [vmem:[%s1110_s0 + $0x28] sm:$0xff] }
   0x9   :  { %776 = vmatpush3.bf16.msra.mxu0 %v773_v8  ;;  %780 = vmatpush3.bf16.msra.mxu1 %v773_v8  ;;  %v381_v26 = vld [vmem:[%s1112_s2 + $0x40] sm:$0xff]  ;;  %v36_v28 = vld [vmem:[%s1110_s0 + $0xa8] sm:$0xff]  ;;  %v21_v29 = vld [vmem:[%s1110_s0 + $0x30] sm:$0xff] }
   0xa   :  { %v37_v30 = vld [vmem:[%s1110_s0 + $0xb0] sm:$0xff]  ;;  %v384_v31 = vld [vmem:[%s1112_s2 + $0x58] sm:$0xff]  ;;  %v23_v35 = vld [vmem:[%s1110_s0 + $0x40] sm:$0xff] }
   0xb   :  { %432 = vperm.xlu1 %786, %v378_v13   ;;  %427 = vperm.xlu0 %785, %v377_v14   ;;  %v383_v32 = vld [vmem:[%s1112_s2 + $0x50] sm:$0xff]  ;;  %v22_v33 = vld [vmem:[%s1110_s0 + $0x38] sm:$0xff]  ;;  %v39_v36 = vld [vmem:[%s1110_s0 + $0xc0] sm:$0xff] }
   0xc   :  { %722 = vmatmul.mubr.msk.f32.vlgmr.msra.gmra.mrb[0].mxu0 %vm51_vm0, %v16_v15  ;;  %746 = vmatmul.mubr.msk.f32.vlgmr.msra.gmra.mrb[0].mxu1 %vm51_vm0, %v32_v16  ;;  %v38_v34 = vld [vmem:[%s1110_s0 + $0xb8] sm:$0xff] }
   0xd   :  { %724 = vmatprep.mubr.msk.f32.mxu0 %vm51_vm0, %v17_v17  ;;  %748 = vmatprep.mubr.msk.f32.mxu1 %vm51_vm0, %v33_v18 }
   0xf   :  { %442 = vperm.xlu1 %786, %v380_v19   ;;  %437 = vperm.xlu0 %785, %v379_v20  }
  0x10   :  { %725 = vmatmul.mubr.msk.f32.gmra.mrb[2].mxu0 %vm51_vm0, %v18_v21  ;;  %749 = vmatmul.mubr.msk.f32.gmra.mrb[2].mxu1 %vm51_vm0, %v34_v22 }
  0x11   :  { %727 = vmatprep.mubr.msk.f32.mxu0 %vm51_vm0, %v19_v23  ;;  %751 = vmatprep.mubr.msk.f32.mxu1 %vm51_vm0, %v35_v24 }
  0x13   :  { %452 = vperm.xlu1 %786, %v382_v25   ;;  %447 = vperm.xlu0 %785, %v381_v26  }
  0x14   :  { %728 = vmatmul.mubr.msk.f32.gmra.mrb[4].mxu0 %vm51_vm0, %v20_v27  ;;  %752 = vmatmul.mubr.msk.f32.gmra.mrb[4].mxu1 %vm51_vm0, %v36_v28 }
  0x15   :  { %730 = vmatprep.mubr.msk.f32.mxu0 %vm51_vm0, %v21_v29  ;;  %754 = vmatprep.mubr.msk.f32.mxu1 %vm51_vm0, %v37_v30 }
  0x17   :  { %462 = vperm.xlu1 %786, %v384_v31   ;;  %457 = vperm.xlu0 %785, %v383_v32  }
  0x18   :  { %8 = vsyncpa [#allocation3], 0  ;;  %731 = vmatmul.mubr.msk.f32.gmra.mrb[6].mxu0 %vm51_vm0, %v22_v33  ;;  %755 = vmatmul.mubr.msk.f32.gmra.mrb[6].mxu1 %vm51_vm0, %v38_v34  ;;  %v386_v37 = vld [vmem:[%s1112_s2 + $0x68] sm:$0xff]  ;;  %v385_v38 = vld [vmem:[%s1112_s2 + $0x60] sm:$0xff] }
  0x19   :  { %733 = vmatprep.mubr.msk.f32.mxu0 %vm51_vm0, %v23_v35  ;;  %757 = vmatprep.mubr.msk.f32.mxu1 %vm51_vm0, %v39_v36  ;;  %v24_v39 = vld [vmem:[%s1110_s0 + $0x48] sm:$0xff]  ;;  %v25_v41 = vld [vmem:[%s1110_s0 + $0x50] sm:$0xff]  ;;  %v388_v43 = vld [vmem:[%s1112_s2 + $0x78] sm:$0xff] }
  0x1a   :  { %v40_v40 = vld [vmem:[%s1110_s0 + $0xc8] sm:$0xff]  ;;  %v41_v42 = vld [vmem:[%s1110_s0 + $0xd0] sm:$0xff]  ;;  %v26_v45 = vld [vmem:[%s1110_s0 + $0x58] sm:$0xff] }
  0x1b   :  { %472 = vperm.xlu1 %786, %v386_v37   ;;  %467 = vperm.xlu0 %785, %v385_v38   ;;  %v387_v44 = vld [vmem:[%s1112_s2 + $0x70] sm:$0xff]  ;;  %v42_v46 = vld [vmem:[%s1110_s0 + $0xd8] sm:$0xff]  ;;  %v27_v47 = vld [vmem:[%s1110_s0 + $0x60] sm:$0xff] }
  0x1c   :  { %734 = vmatmul.mubr.msk.f32.gmra.mrb[8].mxu0 %vm51_vm0, %v24_v39  ;;  %758 = vmatmul.mubr.msk.f32.gmra.mrb[8].mxu1 %vm51_vm0, %v40_v40  ;;  %v43_v48 = vld [vmem:[%s1110_s0 + $0xe0] sm:$0xff]  ;;  %v390_v49 = vld [vmem:[%s1112_s2 + $0x88] sm:$0xff]  ;;  %v29_v53 = vld [vmem:[%s1110_s0 + $0x70] sm:$0xff] }
  0x1d   :  { %736 = vmatprep.mubr.msk.f32.mxu0 %vm51_vm0, %v25_v41  ;;  %760 = vmatprep.mubr.msk.f32.mxu1 %vm51_vm0, %v41_v42  ;;  %v389_v50 = vld [vmem:[%s1112_s2 + $0x80] sm:$0xff]  ;;  %v28_v51 = vld [vmem:[%s1110_s0 + $0x68] sm:$0xff]  ;;  %v45_v54 = vld [vmem:[%s1110_s0 + $0xf0] sm:$0xff] }
  0x1e   :  { %v44_v52 = vld [vmem:[%s1110_s0 + $0xe8] sm:$0xff]  ;;  %v392_v55 = vld [vmem:[%s1112_s2 + $0x98] sm:$0xff]  ;;  %v391_v56 = vld [vmem:[%s1112_s2 + $0x90] sm:$0xff] }
  0x1f   :  { %482 = vperm.xlu1 %786, %v388_v43   ;;  %477 = vperm.xlu0 %785, %v387_v44   ;;  %v30_v57 = vld [vmem:[%s1110_s0 + $0x78] sm:$0xff]  ;;  %v394_v59 = vld [vmem:[%s1112_s2 + $0xa8] sm:$0xff]  ;;  %v393_v60 = vld [vmem:[%s1112_s2 + $0xa0] sm:$0xff] }
  0x20   :  { %737 = vmatmul.mubr.msk.f32.gmra.mrb[10].mxu0 %vm51_vm0, %v26_v45  ;;  %761 = vmatmul.mubr.msk.f32.gmra.mrb[10].mxu1 %vm51_vm0, %v42_v46  ;;  %v46_v58 = vld [vmem:[%s1110_s0 + $0xf8] sm:$0xff]  ;;  %v395_v62 = vld [vmem:[%s1112_s2 + $0xb0] sm:$0xff]  ;;  %v398_v63 = vld [vmem:[%s1112_s2 + $0xc8] sm:$0xff] }
  0x21   :  { %739 = vmatprep.mubr.msk.f32.mxu0 %vm51_vm0, %v27_v47  ;;  %763 = vmatprep.mubr.msk.f32.mxu1 %vm51_vm0, %v43_v48  ;;  %v396_v61 = vld [vmem:[%s1112_s2 + $0xb8] sm:$0xff]  ;;  %v397_v0 = vld [vmem:[%s1112_s2 + $0xc0] sm:$0xff]  ;;  %v399_v2 = vld [vmem:[%s1112_s2 + $0xd0] sm:$0xff] }
  0x22   :  { %v400_v1 = vld [vmem:[%s1112_s2 + $0xd8] sm:$0xff]  ;;  %v402_v3 = vld [vmem:[%s1112_s2 + $0xe8] sm:$0xff]  ;;  %v401_v4 = vld [vmem:[%s1112_s2 + $0xe0] sm:$0xff] }
  0x23   :  { %492 = vperm.xlu1 %786, %v390_v49   ;;  %487 = vperm.xlu0 %785, %v389_v50   ;;  %v404_v5 = vld [vmem:[%s1112_s2 + $0xf8] sm:$0xff]  ;;  %v403_v6 = vld [vmem:[%s1112_s2 + $0xf0] sm:$0xff]  ;;  %s812_s2 = smov [#allocation2]  }
  0x24   :  { %740 = vmatmul.mubr.msk.f32.gmra.mrb[12].mxu0 %vm51_vm0, %v28_v51  ;;  %764 = vmatmul.mubr.msk.f32.gmra.mrb[12].mxu1 %vm51_vm0, %v44_v52  ;;  %s634_s7 = sshll.u32 %s812_s2, 4  ;;  %s635_s7 = int_to_ptr.vmem [resolvable:$true] %s634_s7 }
  0x25   :  { %742 = vmatprep.mubr.msk.f32.mxu0 %vm51_vm0, %v29_v53  ;;  %766 = vmatprep.mubr.msk.f32.mxu1 %vm51_vm0, %v45_v54  ;;  %s787_s8 = scalar_lea.vmem %s635_s7, 4096  ;;  %p792_p1 = scmp.lt.s32.totalorder %s635_s7, %s635_s7 }
  0x26   :  { %p788_p0 = scmp.ne.s32.totalorder %s635_s7, %s787_s8  ;;  %p793_p2 = scmp.lt.s32.totalorder %s787_s8, %s787_s8 }
  0x27   :  { %502 = vperm.xlu1 %786, %v392_v55   ;;  %497 = vperm.xlu0 %785, %v391_v56  }
  0x28   :  { %743 = vmatmul.mubr.msk.f32.gmra.mrb[14].mxu0 %vm51_vm0, %v30_v57  ;;  %767 = vmatmul.mubr.msk.f32.gmra.mrb[14].mxu1 %vm51_vm0, %v46_v58  ;;  %p794_p3 = por %p793_p2, %p792_p1 }
  0x2a   :  { %p795_p4 = pnand %p794_p3, %p788_p0 }
  0x2b   :  { %512 = vperm.xlu1 %786, %v394_v59   ;;  %507 = vperm.xlu0 %785, %v393_v60  }
  0x2f   :  { %522 = vperm.xlu1 %786, %v396_v61   ;;  %517 = vperm.xlu0 %785, %v395_v62  }
  0x33   :  { %532 = vperm.xlu1 %786, %v398_v63   ;;  %527 = vperm.xlu0 %785, %v397_v0  }
  0x37   :  { %542 = vperm.xlu1 %786, %v400_v1   ;;  %537 = vperm.xlu0 %785, %v399_v2  }
  0x3b   :  { %552 = vperm.xlu1 %786, %v402_v3   ;;  %547 = vperm.xlu0 %785, %v401_v4  }
  0x3f   :  { %562 = vperm.xlu1 %786, %v404_v5   ;;  %557 = vperm.xlu0 %785, %v403_v6  }
  0x81   :  { %v418_v7 = vpop.permute.xlu1 %417 }
  0x82   :  { %v408_v8 = vpop.permute.xlu0 %407 }
  0x86   :  { %v423_v9 = vpop.permute.xlu1 %422  ;;  %v413_v10 = vpop.permute.xlu0 %412 }
  0x8a   :  { %v433_v11 = vpop.permute.xlu1 %432  ;;  %v428_v12 = vpop.permute.xlu0 %427 }
  0x8e   :  { %v443_v13 = vpop.permute.xlu1 %442  ;;  %v1071_v14 = vpop.permute.xlu0 %437 }
  0x92   :  { %v1073_v15 = vpop.permute.xlu1 %452  ;;  %v1075_v16 = vpop.permute.xlu0 %447 }
  0x96   :  { %v1077_v17 = vpop.permute.xlu1 %462  ;;  %v1079_v18 = vpop.permute.xlu0 %457 }
  0x9a   :  { %v1081_v19 = vpop.permute.xlu1 %472  ;;  %v1083_v20 = vpop.permute.xlu0 %467 }
  0x9e   :  { %v1085_v21 = vpop.permute.xlu1 %482  ;;  %v1087_v22 = vpop.permute.xlu0 %477 }
  0xa2   :  { %v493_v23 = vpop.permute.xlu1 %492  ;;  %v488_v24 = vpop.permute.xlu0 %487 }
  0xa6   :  { %v503_v25 = vpop.permute.xlu1 %502  ;;  %v498_v26 = vpop.permute.xlu0 %497 }
  0xaa   :  { %v513_v27 = vpop.permute.xlu1 %512  ;;  %v508_v28 = vpop.permute.xlu0 %507 }
  0xae   :  { %v523_v29 = vpop.permute.xlu1 %522  ;;  %v518_v30 = vpop.permute.xlu0 %517 }
  0xb2   :  { %v533_v39 = vpop.permute.xlu1 %532  ;;  %v528_v40 = vpop.permute.xlu0 %527 }
  0xb6   :  { %v543_v57 = vpop.permute.xlu1 %542  ;;  %v538_v58 = vpop.permute.xlu0 %537 }
  0xdf   :  { %v723_v31 = vpop.f32.mrb[0].mxu0  ;;  %v747_v32 = vpop.f32.mrb[0].mxu1 }
  0xe0   :  { %v566_v33 = vmul.f32 %v723_v31, %v413_v10  ;;  %v582_v34 = vmul.f32 %v747_v32, %v493_v23  ;;  %v214_v35 = vpop.f32.mrb[1].mxu0  ;;  %v294_v36 = vpop.f32.mrb[1].mxu1 }
  0xe1   :  { %v565_v37 = vmul.f32 %v408_v8, %v214_v35  ;;  %v581_v38 = vmul.f32 %v488_v24, %v294_v36 }
  0xe2   :  { %598 = vst [vmem:[#allocation2 + $0x8] sm:$0xff] %v566_v33  ;;  %614 = vst [vmem:[#allocation2 + $0x88] sm:$0xff] %v582_v34 }
  0xe3   :  { %597 = vst [vmem:[#allocation2] sm:$0xff] %v565_v37  ;;  %613 = vst [vmem:[#allocation2 + $0x80] sm:$0xff] %v581_v38  ;;  %v726_v41 = vpop.f32.mrb[2].mxu0  ;;  %v750_v42 = vpop.f32.mrb[2].mxu1 }
  0xe4   :  { %v568_v43 = vmul.f32 %v726_v41, %v423_v9  ;;  %v584_v44 = vmul.f32 %v750_v42, %v503_v25  ;;  %v224_v45 = vpop.f32.mrb[3].mxu0  ;;  %v304_v46 = vpop.f32.mrb[3].mxu1 }
  0xe5   :  { %v567_v47 = vmul.f32 %v418_v7, %v224_v45  ;;  %v583_v48 = vmul.f32 %v498_v26, %v304_v46 }
  0xe6   :  { %600 = vst [vmem:[#allocation2 + $0x18] sm:$0xff] %v568_v43  ;;  %616 = vst [vmem:[#allocation2 + $0x98] sm:$0xff] %v584_v44 }
  0xe7   :  { %599 = vst [vmem:[#allocation2 + $0x10] sm:$0xff] %v567_v47  ;;  %615 = vst [vmem:[#allocation2 + $0x90] sm:$0xff] %v583_v48  ;;  %v729_v49 = vpop.f32.mrb[4].mxu0  ;;  %v753_v50 = vpop.f32.mrb[4].mxu1 }
  0xe8   :  { %v570_v51 = vmul.f32 %v729_v49, %v433_v11  ;;  %v586_v52 = vmul.f32 %v753_v50, %v513_v27  ;;  %v234_v53 = vpop.f32.mrb[5].mxu0  ;;  %v314_v54 = vpop.f32.mrb[5].mxu1 }
  0xe9   :  { %v569_v55 = vmul.f32 %v428_v12, %v234_v53  ;;  %v585_v56 = vmul.f32 %v508_v28, %v314_v54  ;;  %v553_v11 = vpop.permute.xlu1 %552  ;;  %v548_v12 = vpop.permute.xlu0 %547 }
  0xea   :  { %602 = vst [vmem:[#allocation2 + $0x28] sm:$0xff] %v570_v51  ;;  %618 = vst [vmem:[#allocation2 + $0xa8] sm:$0xff] %v586_v52 }
  0xeb   :  { %601 = vst [vmem:[#allocation2 + $0x20] sm:$0xff] %v569_v55  ;;  %617 = vst [vmem:[#allocation2 + $0xa0] sm:$0xff] %v585_v56  ;;  %v732_v59 = vpop.f32.mrb[6].mxu0  ;;  %v756_v60 = vpop.f32.mrb[6].mxu1 }
  0xec   :  { %v572_v61 = vmul.f32 %v732_v59, %v443_v13  ;;  %v588_v62 = vmul.f32 %v756_v60, %v523_v29  ;;  %v244_v63 = vpop.f32.mrb[7].mxu0  ;;  %v324_v0 = vpop.f32.mrb[7].mxu1 }
  0xed   :  { %v571_v1 = vmul.f32 %v1071_v14, %v244_v63  ;;  %v587_v2 = vmul.f32 %v518_v30, %v324_v0  ;;  %v563_v34 = vpop.permute.xlu1 %562  ;;  %v558_v35 = vpop.permute.xlu0 %557 }
  0xee   :  { %604 = vst [vmem:[#allocation2 + $0x38] sm:$0xff] %v572_v61  ;;  %620 = vst [vmem:[#allocation2 + $0xb8] sm:$0xff] %v588_v62 }
  0xef   :  { %603 = vst [vmem:[#allocation2 + $0x30] sm:$0xff] %v571_v1  ;;  %619 = vst [vmem:[#allocation2 + $0xb0] sm:$0xff] %v587_v2  ;;  %v735_v3 = vpop.f32.mrb[8].mxu0  ;;  %v759_v4 = vpop.f32.mrb[8].mxu1 }
  0xf0   :  { %v574_v5 = vmul.f32 %v735_v3, %v1073_v15  ;;  %v590_v6 = vmul.f32 %v759_v4, %v533_v39  ;;  %v254_v7 = vpop.f32.mrb[9].mxu0  ;;  %v334_v8 = vpop.f32.mrb[9].mxu1 }
  0xf1   :  { %v573_v9 = vmul.f32 %v1075_v16, %v254_v7  ;;  %v589_v10 = vmul.f32 %v528_v40, %v334_v8 }
  0xf2   :  { %606 = vst [vmem:[#allocation2 + $0x48] sm:$0xff] %v574_v5  ;;  %622 = vst [vmem:[#allocation2 + $0xc8] sm:$0xff] %v590_v6 }
  0xf3   :  { %605 = vst [vmem:[#allocation2 + $0x40] sm:$0xff] %v573_v9  ;;  %621 = vst [vmem:[#allocation2 + $0xc0] sm:$0xff] %v589_v10  ;;  %v738_v13 = vpop.f32.mrb[10].mxu0  ;;  %v762_v14 = vpop.f32.mrb[10].mxu1 }
  0xf4   :  { %v576_v23 = vmul.f32 %v738_v13, %v1077_v17  ;;  %v592_v24 = vmul.f32 %v762_v14, %v543_v57  ;;  %v264_v25 = vpop.f32.mrb[11].mxu0  ;;  %v344_v26 = vpop.f32.mrb[11].mxu1 }
  0xf5   :  { %v575_v15 = vmul.f32 %v1079_v18, %v264_v25  ;;  %v591_v27 = vmul.f32 %v538_v58, %v344_v26 }
  0xf6   :  { %608 = vst [vmem:[#allocation2 + $0x58] sm:$0xff] %v576_v23  ;;  %624 = vst [vmem:[#allocation2 + $0xd8] sm:$0xff] %v592_v24 }
  0xf7   :  { %607 = vst [vmem:[#allocation2 + $0x50] sm:$0xff] %v575_v15  ;;  %623 = vst [vmem:[#allocation2 + $0xd0] sm:$0xff] %v591_v27  ;;  %v741_v16 = vpop.f32.mrb[12].mxu0  ;;  %v765_v28 = vpop.f32.mrb[12].mxu1 }
  0xf8   :  { %v578_v29 = vmul.f32 %v741_v16, %v1081_v19  ;;  %v594_v30 = vmul.f32 %v765_v28, %v553_v11  ;;  %v274_v31 = vpop.f32.mrb[13].mxu0  ;;  %v354_v32 = vpop.f32.mrb[13].mxu1 }
  0xf9   :  { %v577_v33 = vmul.f32 %v1083_v20, %v274_v31  ;;  %v593_v17 = vmul.f32 %v548_v12, %v354_v32 }
  0xfa   :  { %610 = vst [vmem:[#allocation2 + $0x68] sm:$0xff] %v578_v29  ;;  %626 = vst [vmem:[#allocation2 + $0xe8] sm:$0xff] %v594_v30 }
  0xfb   :  { %609 = vst [vmem:[#allocation2 + $0x60] sm:$0xff] %v577_v33  ;;  %625 = vst [vmem:[#allocation2 + $0xe0] sm:$0xff] %v593_v17  ;;  %v744_v18 = vpop.f32.mrb[14].mxu0  ;;  %v768_v36 = vpop.f32.mrb[14].mxu1 }
  0xfc   :  { %v580_v37 = vmul.f32 %v744_v18, %v1085_v21  ;;  %v596_v38 = vmul.f32 %v768_v36, %v563_v34  ;;  %v284_v19 = vpop.f32.mrb[15].mxu0  ;;  %v364_v39 = vpop.f32.mrb[15].mxu1 }
  0xfd   :  { %v579_v40 = vmul.f32 %v1087_v22, %v284_v19  ;;  %v595_v20 = vmul.f32 %v558_v35, %v364_v39 }
  0xfe   :  { %612 = vst [vmem:[#allocation2 + $0x78] sm:$0xff] %v580_v37  ;;  %628 = vst [vmem:[#allocation2 + $0xf8] sm:$0xff] %v596_v38 }
  0xff   :  { %611 = vst [vmem:[#allocation2 + $0x70] sm:$0xff] %v579_v40  ;;  %627 = vst [vmem:[#allocation2 + $0xf0] sm:$0xff] %v595_v20 }
 0x100   :  { %798 = shalt.err (!%p795_p4)
}
 0x101   :  { %s799_s11 = scalar_lea.hbm %s1113_s3, 4096 }
 0x102   :  { %p800_p5 = scmp.ne.s32.totalorder %s1113_s3, %s799_s11  ;;  %p803_p6 = scmp.lt.u32.totalorder %s799_s11, %s1113_s3 }
 0x104   :  { %p805_p7 = pnand %p803_p6, %p800_p5 }
 0x106   :  { %808 = shalt.err (!%p805_p7)
}
 0x107   :  { %s813_s16 = smov 128   ;;  %s814_s17 = smov 8  }
 0x108   :  { %640 = dma.vmem_to_hbm [thread:$0]  %s635_s7, 4096, %s1113_s3, [#allocation3], %s813_s16, %s813_s16, %s814_s17  }
 0x109   :  { %809 = dma.done.wait [#allocation3], 4096  }
 0x10a   :  { %810 = vsyncadd [#allocation3], 4294963200 }
 0x10b   :  { %644 = vsyncpa [#allocation3], 1 }

</bundles_post_ra>
